<compile_context>
chip_gen: v5e
topology: v5e:2x2
jax: 0.10.0
libtpu: 0.0.40
codegen_flags: <defaults>
</compile_context>

<pallas_src>
import jax
import jax.numpy as jnp
from jax.experimental import pallas as pl
from jax.experimental.pallas import tpu as pltpu


def _round_up(x, m):
    return (x + m - 1) // m * m


def _pick_tile_oh(OH, OW, N, *, max_tm=2048, max_unroll=32):
    """Pick the output-row tile TOH.

    Prefers tiles whose lane width TOH*OW is a multiple of 128 (dense,
    unmasked stores), <= max_tm, with a bounded in-kernel unroll.  Falls back
    to the full image (a full last dim is always a legal block shape).
    """
    divs = [t for t in range(1, OH + 1) if OH % t == 0]
    pref = [t for t in divs
            if (t * OW) % 128 == 0 and t * OW <= max_tm and t <= max_unroll]
    if pref:
        toh = max(pref, key=lambda t: t * OW)
    else:
        # TODO(synk): when OH has no 128-lane-friendly divisor, pad OH*OW up to
        # a multiple of 128 in out_shape and slice afterwards instead of this
        # full-image fallback.
        toh = OH
    # v7x has 2 TensorCores per chip: keep >= 2 programs on the parallel grid.
    if N * (OH // toh) < 2:
        smaller = ([t for t in pref if t < toh]
                   or [t for t in divs if t < toh and (t * OW) % 128 == 0])
        if smaller:
            toh = max(smaller, key=lambda t: t * OW)
    return toh


def sgr_encoder_conv(x_nchw, weight, bias, *, stride=2, padding=1,
                     operand_dtype=None):
    """Conv2d(kernel, stride=2, padding) + ReLU, PyTorch NCHW convention.

    x_nchw : (N, Cin, H, W)       float32
    weight : (Cout, Cin, KH, KW)  float32
    bias   : (Cout,)              float32
    operand_dtype : dtype for the streamed operands (e.g. jnp.bfloat16 on
                    v6e/v7x); accumulation is always float32.
    returns: (N, Cout, OH, OW)
    """
    N, Cin, H, W = x_nchw.shape
    Cout, Cin_w, KH, KW = weight.shape
    assert Cin_w == Cin
    S, P = stride, padding
    # Specialised for stride=2 / even kernel via space-to-depth.
    # TODO(synk): a general stride / odd-kernel path would need plain im2col.
    assert S == 2 and KH % 2 == 0 and KW % 2 == 0, "specialized for stride=2, even kernel"

    OH = (H + 2 * P - KH) // S + 1
    OW = (W + 2 * P - KW) // S + 1
    A, B = KH // 2, KW // 2          # equivalent stride-1 kernel after space-to-depth
    C4 = 4 * Cin                     # space-to-depth channel count
    K = A * B * C4                   # fused contraction size (64 for 4x4 kernel, Cin=4)

    if operand_dtype is None:
        operand_dtype = x_nchw.dtype
    out_dtype = x_nchw.dtype

    # ---- pad + space-to-depth, channel-on-sublane / width-on-lane layout -------
    Hp, Wp = H + 2 * P, W + 2 * P
    Hp2, Wp2 = Hp + (Hp % 2), Wp + (Wp % 2)          # even spatial extents
    Hs, Ws = Hp2 // 2, Wp2 // 2
    # Tap slices must stay in-bounds (VMEM reads are unchecked at runtime).
    assert Hs >= OH + A - 1 and Ws >= OW + B - 1
    x_pad = jnp.pad(x_nchw, ((0, 0), (0, 0),
                             (P, P + (Hp2 - Hp)), (P, P + (Wp2 - Wp))))
    # (N,Cin,Hs,2,Ws,2) -> (N, Hs, dh, dw, Cin, Ws) -> (N, Hs, C4, Ws)
    x_sd = x_pad.reshape(N, Cin, Hs, 2, Ws, 2)
    x_sd = jnp.transpose(x_sd, (0, 2, 3, 5, 1, 4)).reshape(N, Hs, C4, Ws)
    x_sd = x_sd.astype(operand_dtype)

    # ---- tiling & per-tile halo blocks ------------------------------------------
    TOH = _pick_tile_oh(OH, OW, N)
    TOHp = TOH + A - 1               # rows needed per tile (halo)
    TM = TOH * OW                    # lane width of the output tile
    n_t = OH // TOH
    OHW = OH * OW

    # Non-overlapping HBM blocks: duplicate the (A-1)-row halo per tile so the
    # BlockSpec index map stays a plain block index.
    # TODO(synk): fuse pad + space-to-depth + halo gather into the producer (or
    # assemble in-kernel via strided DMA) to remove this extra HBM relayout pass.
    row_idx = jnp.arange(n_t)[:, None] * TOH + jnp.arange(TOHp)[None, :]
    x_tiles = jnp.take(x_sd, row_idx, axis=1)        # (N, n_t, TOHp, C4, Ws)

    # Weights -> (Cout, K) with k = (i*B + j)*C4 + (dh*2 + dw)*Cin + cin,
    # matching the in-kernel tap-concat order and the space-to-depth channel order.
    w6 = weight.reshape(Cout, Cin, A, 2, B, 2)                   # (co,cin,i,dh,j,dw)
    w_flat = jnp.transpose(w6, (0, 2, 4, 3, 5, 1)).reshape(Cout, K)
    w_flat = w_flat.astype(operand_dtype)
    b_col = bias.reshape(Cout, 1).astype(jnp.float32)

    # ---- kernel: fused-K MXU matmul per output row, (Cout, TM) dense store ------
    def kernel(x_ref, w_ref, b_ref, o_ref):
        # x_ref: (1, 1, TOHp, C4, Ws)  halo'd space-to-depth rows (chan=sublane, width=lane)
        # w_ref: (Cout, K)             fused-tap weights (resident across the grid)
        # b_ref: (Cout, 1)
        # o_ref: (1, Cout, TM)         lane-dense output tile
        w = w_ref[...]
        rows = [x_ref[0, 0, r, :, :] for r in range(TOHp)]       # (C4, Ws) each
        ys = []
        for oh in range(TOH):
            taps = [rows[oh + i][:, j:j + OW]                    # (C4, OW) per tap
                    for i in range(A) for j in range(B)]
            rhs = jnp.concatenate(taps, axis=0)                  # (K, OW)
            ys.append(jnp.dot(w, rhs, preferred_element_type=jnp.float32))
        acc = ys[0] if TOH == 1 else jnp.concatenate(ys, axis=1)  # (Cout, TM)
        acc = jnp.maximum(acc + b_ref[...], 0.0)
        o_ref[0, :, :] = acc.astype(o_ref.dtype)

    # ---- VMEM budget from (8,128)-padded tile sizes ------------------------------
    op_b = jnp.dtype(operand_dtype).itemsize
    out_b = jnp.dtype(out_dtype).itemsize
    in_blk = TOHp * _round_up(C4, 8) * _round_up(Ws, 128) * op_b
    out_blk = _round_up(Cout, 8) * _round_up(TM, 128) * out_b
    resident = (_round_up(Cout, 8) * _round_up(K, 128) * op_b
                + _round_up(Cout, 8) * 128 * 4)
    scratch = (_round_up(K, 8) * _round_up(OW, 128) * 4          # rhs staging
               + _round_up(Cout, 8) * _round_up(TM, 128) * 4)    # f32 accumulator
    vmem_limit = int(max(32 * 1024 * 1024,
                         2 * (in_blk + out_blk) + resident + scratch + (4 << 20)))

    out = pl.pallas_call(
        kernel,
        out_shape=jax.ShapeDtypeStruct((N, Cout, OHW), out_dtype),
        grid_spec=pltpu.PrefetchScalarGridSpec(
            num_scalar_prefetch=0,
            grid=(N, n_t),
            in_specs=[
                # per-tile halo block: DMA'd each grid step (v7x VMEM-safe)
                pl.BlockSpec((1, 1, TOHp, C4, Ws), lambda n, t: (n, t, 0, 0, 0)),
                # weights / bias: constant-indexed -> resident across the grid
                pl.BlockSpec((Cout, K), lambda n, t: (0, 0)),
                pl.BlockSpec((Cout, 1), lambda n, t: (0, 0)),
            ],
            out_specs=pl.BlockSpec((1, Cout, TM), lambda n, t: (n, 0, t)),
        ),
        compiler_params=pltpu.CompilerParams(
            dimension_semantics=("parallel", "parallel"),
            vmem_limit_bytes=vmem_limit,
        ),
    )(x_tiles, w_flat, b_col)

    # (N, Cout, OH*OW) -> (N, Cout, OH, OW): pure reshape, no transpose.
    return out.reshape(N, Cout, OH, OW)


def _reference(x, weight, bias, *, stride=2, padding=1):
    y = jax.lax.conv_general_dilated(
        x, weight,
        window_strides=(stride, stride),
        padding=[(padding, padding), (padding, padding)],
        dimension_numbers=("NCHW", "OIHW", "NCHW"),
    )
    return jnp.maximum(y + bias.reshape(1, -1, 1, 1), 0.0)


if __name__ == "__main__":
    # Small shapes consistent with the module: in_channels=4, out_channels=8.
    N, Cin, H, W = 2, 4, 16, 16
    Cout, KH, KW = 8, 4, 4

    key = jax.random.PRNGKey(0)
    kx, kw, kb = jax.random.split(key, 3)
    x = jax.random.normal(kx, (N, Cin, H, W), dtype=jnp.float32)
    fan_in = Cin * KH * KW
    bound = 1.0 / float(fan_in) ** 0.5
    weight = jax.random.uniform(kw, (Cout, Cin, KH, KW), jnp.float32, -bound, bound)
    bias = jax.random.uniform(kb, (Cout,), jnp.float32, -bound, bound)

    ref = _reference(x, weight, bias, stride=2, padding=1)

    # f32 operand path (tight tolerance).
    out = jax.block_until_ready(sgr_encoder_conv(x, weight, bias, stride=2, padding=1))
    assert out.shape == (N, Cout, 8, 8), out.shape
    err = float(jnp.max(jnp.abs(out - ref)))
    assert jnp.allclose(out, ref, atol=1e-4, rtol=1e-4), err

    # bf16 operand path (v6e/v7x bandwidth option; f32 accumulation, loose tolerance).
    out_bf16 = jax.block_until_ready(
        sgr_encoder_conv(x, weight, bias, stride=2, padding=1,
                         operand_dtype=jnp.bfloat16))
    err_bf16 = float(jnp.max(jnp.abs(out_bf16 - ref)))
    assert jnp.allclose(out_bf16, ref, atol=1e-1, rtol=1e-1), err_bf16

    print("KERNEL_OK")
</pallas_src>

<mosaic_0001>
module attributes {stable_mosaic.version = 11 : i64} {
  func.func @kernel(%arg0: i32, %arg1: i32, %arg2: memref<1x1x9x16x9xf32, #tpu.memory_space<vmem>>, %arg3: memref<8x64xf32, #tpu.memory_space<vmem>>, %arg4: memref<8x1xf32, #tpu.memory_space<vmem>>, %arg5: memref<1x8x64xf32, #tpu.memory_space<vmem>>) attributes {dimension_semantics = [#tpu.dimension_semantics<parallel>, #tpu.dimension_semantics<parallel>], iteration_bounds = array<i64: 2, 1>, scalar_prefetch = 0 : i64, scratch_operands = 0 : i64, tpu.core_type = #tpu.core_type<tc>, window_params = [{transform_indices = @transform_0, window_bounds = array<i64: 1, 1, 9, 16, 9>}, {pipeline_mode = #tpu.pipeline_mode<synchronous>, transform_indices = @transform_1, window_bounds = array<i64: 8, 64>}, {pipeline_mode = #tpu.pipeline_mode<synchronous>, transform_indices = @transform_2, window_bounds = array<i64: 8, 1>}, {transform_indices = @transform_3, window_bounds = array<i64: 1, 8, 64>}]} {
    %c0 = arith.constant 0 : index
    %c0_0 = arith.constant 0 : index
    %0 = vector.load %arg3[%c0, %c0_0] : memref<8x64xf32, #tpu.memory_space<vmem>>, vector<8x64xf32>
    %c0_1 = arith.constant 0 : index
    %c0_2 = arith.constant 0 : index
    %c0_3 = arith.constant 0 : index
    %c0_4 = arith.constant 0 : index
    %c0_5 = arith.constant 0 : index
    %1 = vector.load %arg2[%c0_1, %c0_2, %c0_3, %c0_4, %c0_5] : memref<1x1x9x16x9xf32, #tpu.memory_space<vmem>>, vector<1x1x1x16x9xf32>
    %2 = vector.shape_cast %1 : vector<1x1x1x16x9xf32> to vector<16x9xf32>
    %c0_6 = arith.constant 0 : index
    %c0_7 = arith.constant 0 : index
    %c1 = arith.constant 1 : index
    %c0_8 = arith.constant 0 : index
    %c0_9 = arith.constant 0 : index
    %3 = vector.load %arg2[%c0_6, %c0_7, %c1, %c0_8, %c0_9] : memref<1x1x9x16x9xf32, #tpu.memory_space<vmem>>, vector<1x1x1x16x9xf32>
    %4 = vector.shape_cast %3 : vector<1x1x1x16x9xf32> to vector<16x9xf32>
    %c0_10 = arith.constant 0 : index
    %c0_11 = arith.constant 0 : index
    %c2 = arith.constant 2 : index
    %c0_12 = arith.constant 0 : index
    %c0_13 = arith.constant 0 : index
    %5 = vector.load %arg2[%c0_10, %c0_11, %c2, %c0_12, %c0_13] : memref<1x1x9x16x9xf32, #tpu.memory_space<vmem>>, vector<1x1x1x16x9xf32>
    %6 = vector.shape_cast %5 : vector<1x1x1x16x9xf32> to vector<16x9xf32>
    %c0_14 = arith.constant 0 : index
    %c0_15 = arith.constant 0 : index
    %c3 = arith.constant 3 : index
    %c0_16 = arith.constant 0 : index
    %c0_17 = arith.constant 0 : index
    %7 = vector.load %arg2[%c0_14, %c0_15, %c3, %c0_16, %c0_17] : memref<1x1x9x16x9xf32, #tpu.memory_space<vmem>>, vector<1x1x1x16x9xf32>
    %8 = vector.shape_cast %7 : vector<1x1x1x16x9xf32> to vector<16x9xf32>
    %c0_18 = arith.constant 0 : index
    %c0_19 = arith.constant 0 : index
    %c4 = arith.constant 4 : index
    %c0_20 = arith.constant 0 : index
    %c0_21 = arith.constant 0 : index
    %9 = vector.load %arg2[%c0_18, %c0_19, %c4, %c0_20, %c0_21] : memref<1x1x9x16x9xf32, #tpu.memory_space<vmem>>, vector<1x1x1x16x9xf32>
    %10 = vector.shape_cast %9 : vector<1x1x1x16x9xf32> to vector<16x9xf32>
    %c0_22 = arith.constant 0 : index
    %c0_23 = arith.constant 0 : index
    %c5 = arith.constant 5 : index
    %c0_24 = arith.constant 0 : index
    %c0_25 = arith.constant 0 : index
    %11 = vector.load %arg2[%c0_22, %c0_23, %c5, %c0_24, %c0_25] : memref<1x1x9x16x9xf32, #tpu.memory_space<vmem>>, vector<1x1x1x16x9xf32>
    %12 = vector.shape_cast %11 : vector<1x1x1x16x9xf32> to vector<16x9xf32>
    %c0_26 = arith.constant 0 : index
    %c0_27 = arith.constant 0 : index
    %c6 = arith.constant 6 : index
    %c0_28 = arith.constant 0 : index
    %c0_29 = arith.constant 0 : index
    %13 = vector.load %arg2[%c0_26, %c0_27, %c6, %c0_28, %c0_29] : memref<1x1x9x16x9xf32, #tpu.memory_space<vmem>>, vector<1x1x1x16x9xf32>
    %14 = vector.shape_cast %13 : vector<1x1x1x16x9xf32> to vector<16x9xf32>
    %c0_30 = arith.constant 0 : index
    %c0_31 = arith.constant 0 : index
    %c7 = arith.constant 7 : index
    %c0_32 = arith.constant 0 : index
    %c0_33 = arith.constant 0 : index
    %15 = vector.load %arg2[%c0_30, %c0_31, %c7, %c0_32, %c0_33] : memref<1x1x9x16x9xf32, #tpu.memory_space<vmem>>, vector<1x1x1x16x9xf32>
    %16 = vector.shape_cast %15 : vector<1x1x1x16x9xf32> to vector<16x9xf32>
    %c0_34 = arith.constant 0 : index
    %c0_35 = arith.constant 0 : index
    %c8 = arith.constant 8 : index
    %c0_36 = arith.constant 0 : index
    %c0_37 = arith.constant 0 : index
    %17 = vector.load %arg2[%c0_34, %c0_35, %c8, %c0_36, %c0_37] : memref<1x1x9x16x9xf32, #tpu.memory_space<vmem>>, vector<1x1x1x16x9xf32>
    %18 = vector.shape_cast %17 : vector<1x1x1x16x9xf32> to vector<16x9xf32>
    %19 = vector.extract_strided_slice %2 {offsets = [0, 0], sizes = [16, 8], strides = [1, 1]} : vector<16x9xf32> to vector<16x8xf32>
    %20 = vector.extract_strided_slice %2 {offsets = [0, 1], sizes = [16, 8], strides = [1, 1]} : vector<16x9xf32> to vector<16x8xf32>
    %21 = vector.extract_strided_slice %4 {offsets = [0, 0], sizes = [16, 8], strides = [1, 1]} : vector<16x9xf32> to vector<16x8xf32>
    %22 = vector.extract_strided_slice %4 {offsets = [0, 1], sizes = [16, 8], strides = [1, 1]} : vector<16x9xf32> to vector<16x8xf32>
    %23 = tpu.concatenate %19, %20, %21, %22 in 0 : vector<16x8xf32>, vector<16x8xf32>, vector<16x8xf32>, vector<16x8xf32> -> vector<64x8xf32>
    %cst = arith.constant dense<0.000000e+00> : vector<8x8xf32>
    %24 = tpu.matmul %0, %23, %cst {dimension_numbers = #tpu.dot_dimension_numbers<[1], [0], [0], [1], [0, 0, 1, 1], [], []>} : vector<8x64xf32>, vector<64x8xf32>, vector<8x8xf32> -> vector<8x8xf32>
    %25 = vector.extract_strided_slice %4 {offsets = [0, 0], sizes = [16, 8], strides = [1, 1]} : vector<16x9xf32> to vector<16x8xf32>
    %26 = vector.extract_strided_slice %4 {offsets = [0, 1], sizes = [16, 8], strides = [1, 1]} : vector<16x9xf32> to vector<16x8xf32>
    %27 = vector.extract_strided_slice %6 {offsets = [0, 0], sizes = [16, 8], strides = [1, 1]} : vector<16x9xf32> to vector<16x8xf32>
    %28 = vector.extract_strided_slice %6 {offsets = [0, 1], sizes = [16, 8], strides = [1, 1]} : vector<16x9xf32> to vector<16x8xf32>
    %29 = tpu.concatenate %25, %26, %27, %28 in 0 : vector<16x8xf32>, vector<16x8xf32>, vector<16x8xf32>, vector<16x8xf32> -> vector<64x8xf32>
    %cst_38 = arith.constant dense<0.000000e+00> : vector<8x8xf32>
    %30 = tpu.matmul %0, %29, %cst_38 {dimension_numbers = #tpu.dot_dimension_numbers<[1], [0], [0], [1], [0, 0, 1, 1], [], []>} : vector<8x64xf32>, vector<64x8xf32>, vector<8x8xf32> -> vector<8x8xf32>
    %31 = vector.extract_strided_slice %6 {offsets = [0, 0], sizes = [16, 8], strides = [1, 1]} : vector<16x9xf32> to vector<16x8xf32>
    %32 = vector.extract_strided_slice %6 {offsets = [0, 1], sizes = [16, 8], strides = [1, 1]} : vector<16x9xf32> to vector<16x8xf32>
    %33 = vector.extract_strided_slice %8 {offsets = [0, 0], sizes = [16, 8], strides = [1, 1]} : vector<16x9xf32> to vector<16x8xf32>
    %34 = vector.extract_strided_slice %8 {offsets = [0, 1], sizes = [16, 8], strides = [1, 1]} : vector<16x9xf32> to vector<16x8xf32>
    %35 = tpu.concatenate %31, %32, %33, %34 in 0 : vector<16x8xf32>, vector<16x8xf32>, vector<16x8xf32>, vector<16x8xf32> -> vector<64x8xf32>
    %cst_39 = arith.constant dense<0.000000e+00> : vector<8x8xf32>
    %36 = tpu.matmul %0, %35, %cst_39 {dimension_numbers = #tpu.dot_dimension_numbers<[1], [0], [0], [1], [0, 0, 1, 1], [], []>} : vector<8x64xf32>, vector<64x8xf32>, vector<8x8xf32> -> vector<8x8xf32>
    %37 = vector.extract_strided_slice %8 {offsets = [0, 0], sizes = [16, 8], strides = [1, 1]} : vector<16x9xf32> to vector<16x8xf32>
    %38 = vector.extract_strided_slice %8 {offsets = [0, 1], sizes = [16, 8], strides = [1, 1]} : vector<16x9xf32> to vector<16x8xf32>
    %39 = vector.extract_strided_slice %10 {offsets = [0, 0], sizes = [16, 8], strides = [1, 1]} : vector<16x9xf32> to vector<16x8xf32>
    %40 = vector.extract_strided_slice %10 {offsets = [0, 1], sizes = [16, 8], strides = [1, 1]} : vector<16x9xf32> to vector<16x8xf32>
    %41 = tpu.concatenate %37, %38, %39, %40 in 0 : vector<16x8xf32>, vector<16x8xf32>, vector<16x8xf32>, vector<16x8xf32> -> vector<64x8xf32>
    %cst_40 = arith.constant dense<0.000000e+00> : vector<8x8xf32>
    %42 = tpu.matmul %0, %41, %cst_40 {dimension_numbers = #tpu.dot_dimension_numbers<[1], [0], [0], [1], [0, 0, 1, 1], [], []>} : vector<8x64xf32>, vector<64x8xf32>, vector<8x8xf32> -> vector<8x8xf32>
    %43 = vector.extract_strided_slice %10 {offsets = [0, 0], sizes = [16, 8], strides = [1, 1]} : vector<16x9xf32> to vector<16x8xf32>
    %44 = vector.extract_strided_slice %10 {offsets = [0, 1], sizes = [16, 8], strides = [1, 1]} : vector<16x9xf32> to vector<16x8xf32>
    %45 = vector.extract_strided_slice %12 {offsets = [0, 0], sizes = [16, 8], strides = [1, 1]} : vector<16x9xf32> to vector<16x8xf32>
    %46 = vector.extract_strided_slice %12 {offsets = [0, 1], sizes = [16, 8], strides = [1, 1]} : vector<16x9xf32> to vector<16x8xf32>
    %47 = tpu.concatenate %43, %44, %45, %46 in 0 : vector<16x8xf32>, vector<16x8xf32>, vector<16x8xf32>, vector<16x8xf32> -> vector<64x8xf32>
    %cst_41 = arith.constant dense<0.000000e+00> : vector<8x8xf32>
    %48 = tpu.matmul %0, %47, %cst_41 {dimension_numbers = #tpu.dot_dimension_numbers<[1], [0], [0], [1], [0, 0, 1, 1], [], []>} : vector<8x64xf32>, vector<64x8xf32>, vector<8x8xf32> -> vector<8x8xf32>
    %49 = vector.extract_strided_slice %12 {offsets = [0, 0], sizes = [16, 8], strides = [1, 1]} : vector<16x9xf32> to vector<16x8xf32>
    %50 = vector.extract_strided_slice %12 {offsets = [0, 1], sizes = [16, 8], strides = [1, 1]} : vector<16x9xf32> to vector<16x8xf32>
    %51 = vector.extract_strided_slice %14 {offsets = [0, 0], sizes = [16, 8], strides = [1, 1]} : vector<16x9xf32> to vector<16x8xf32>
    %52 = vector.extract_strided_slice %14 {offsets = [0, 1], sizes = [16, 8], strides = [1, 1]} : vector<16x9xf32> to vector<16x8xf32>
    %53 = tpu.concatenate %49, %50, %51, %52 in 0 : vector<16x8xf32>, vector<16x8xf32>, vector<16x8xf32>, vector<16x8xf32> -> vector<64x8xf32>
    %cst_42 = arith.constant dense<0.000000e+00> : vector<8x8xf32>
    %54 = tpu.matmul %0, %53, %cst_42 {dimension_numbers = #tpu.dot_dimension_numbers<[1], [0], [0], [1], [0, 0, 1, 1], [], []>} : vector<8x64xf32>, vector<64x8xf32>, vector<8x8xf32> -> vector<8x8xf32>
    %55 = vector.extract_strided_slice %14 {offsets = [0, 0], sizes = [16, 8], strides = [1, 1]} : vector<16x9xf32> to vector<16x8xf32>
    %56 = vector.extract_strided_slice %14 {offsets = [0, 1], sizes = [16, 8], strides = [1, 1]} : vector<16x9xf32> to vector<16x8xf32>
    %57 = vector.extract_strided_slice %16 {offsets = [0, 0], sizes = [16, 8], strides = [1, 1]} : vector<16x9xf32> to vector<16x8xf32>
    %58 = vector.extract_strided_slice %16 {offsets = [0, 1], sizes = [16, 8], strides = [1, 1]} : vector<16x9xf32> to vector<16x8xf32>
    %59 = tpu.concatenate %55, %56, %57, %58 in 0 : vector<16x8xf32>, vector<16x8xf32>, vector<16x8xf32>, vector<16x8xf32> -> vector<64x8xf32>
    %cst_43 = arith.constant dense<0.000000e+00> : vector<8x8xf32>
    %60 = tpu.matmul %0, %59, %cst_43 {dimension_numbers = #tpu.dot_dimension_numbers<[1], [0], [0], [1], [0, 0, 1, 1], [], []>} : vector<8x64xf32>, vector<64x8xf32>, vector<8x8xf32> -> vector<8x8xf32>
    %61 = vector.extract_strided_slice %16 {offsets = [0, 0], sizes = [16, 8], strides = [1, 1]} : vector<16x9xf32> to vector<16x8xf32>
    %62 = vector.extract_strided_slice %16 {offsets = [0, 1], sizes = [16, 8], strides = [1, 1]} : vector<16x9xf32> to vector<16x8xf32>
    %63 = vector.extract_strided_slice %18 {offsets = [0, 0], sizes = [16, 8], strides = [1, 1]} : vector<16x9xf32> to vector<16x8xf32>
    %64 = vector.extract_strided_slice %18 {offsets = [0, 1], sizes = [16, 8], strides = [1, 1]} : vector<16x9xf32> to vector<16x8xf32>
    %65 = tpu.concatenate %61, %62, %63, %64 in 0 : vector<16x8xf32>, vector<16x8xf32>, vector<16x8xf32>, vector<16x8xf32> -> vector<64x8xf32>
    %cst_44 = arith.constant dense<0.000000e+00> : vector<8x8xf32>
    %66 = tpu.matmul %0, %65, %cst_44 {dimension_numbers = #tpu.dot_dimension_numbers<[1], [0], [0], [1], [0, 0, 1, 1], [], []>} : vector<8x64xf32>, vector<64x8xf32>, vector<8x8xf32> -> vector<8x8xf32>
    %67 = tpu.concatenate %24, %30, %36, %42, %48, %54, %60, %66 in 1 : vector<8x8xf32>, vector<8x8xf32>, vector<8x8xf32>, vector<8x8xf32>, vector<8x8xf32>, vector<8x8xf32>, vector<8x8xf32>, vector<8x8xf32> -> vector<8x64xf32>
    %c0_45 = arith.constant 0 : index
    %c0_46 = arith.constant 0 : index
    %68 = vector.load %arg4[%c0_45, %c0_46] : memref<8x1xf32, #tpu.memory_space<vmem>>, vector<8x1xf32>
    %69 = vector.broadcast %68 : vector<8x1xf32> to vector<8x64xf32>
    %70 = arith.addf %67, %69 : vector<8x64xf32>
    %cst_47 = arith.constant 0.000000e+00 : f32
    %71 = vector.broadcast %cst_47 : f32 to vector<8x64xf32>
    %72 = arith.maximumf %70, %71 : vector<8x64xf32>
    %c0_48 = arith.constant 0 : index
    %c0_49 = arith.constant 0 : index
    %c0_50 = arith.constant 0 : index
    %73 = vector.load %arg5[%c0_48, %c0_49, %c0_50] : memref<1x8x64xf32, #tpu.memory_space<vmem>>, vector<1x8x64xf32>
    %74 = vector.shape_cast %73 : vector<1x8x64xf32> to vector<8x64xf32>
    %75 = vector.shape_cast %72 : vector<8x64xf32> to vector<1x8x64xf32>
    tpu.vector_store %arg5[%c0_48, %c0_49, %c0_50], %75 {strides = array<i32>} : memref<1x8x64xf32, #tpu.memory_space<vmem>>, vector<1x8x64xf32>,
    return
  }
  func.func @transform_0(%arg0: i32, %arg1: i32) -> (i32, i32, i32, i32, i32) {
    %c0_i32 = arith.constant 0 : i32
    %c0_i32_0 = arith.constant 0 : i32
    %c0_i32_1 = arith.constant 0 : i32
    %c0_i32_2 = arith.constant 0 : i32
    return %arg0, %arg1, %c0_i32, %c0_i32_0, %c0_i32_1 : i32, i32, i32, i32, i32
  }
  func.func @transform_1(%arg0: i32, %arg1: i32) -> (i32, i32) {
    %c0_i32 = arith.constant 0 : i32
    %c0_i32_0 = arith.constant 0 : i32
    %c0_i32_1 = arith.constant 0 : i32
    return %c0_i32, %c0_i32_0 : i32, i32
  }
  func.func @transform_2(%arg0: i32, %arg1: i32) -> (i32, i32) {
    %c0_i32 = arith.constant 0 : i32
    %c0_i32_0 = arith.constant 0 : i32
    %c0_i32_1 = arith.constant 0 : i32
    return %c0_i32, %c0_i32_0 : i32, i32
  }
  func.func @transform_3(%arg0: i32, %arg1: i32) -> (i32, i32, i32) {
    %c0_i32 = arith.constant 0 : i32
    %c0_i32_0 = arith.constant 0 : i32
    return %arg0, %c0_i32, %arg1 : i32, i32, i32
  }
}

</mosaic_0001>

<bundles_post_ra>
// kernel: tpu_custom_call.1
= control target key start
LH: loop header
LB: loop body
LE: loop exit
PB: predicated region body
PF: predicated region fallthrough
CT: control target
= control target key end

     0   :  { %8 = vsyncpa [#allocation3], 0  ;;  %s1099_s0 = inlined_call_operand.vmem [shape: f32[2,1,9,16,9], index: 0, kind: input, shape index: {}]   ;;  %s1100_s1 = inlined_call_operand.vmem [shape: f32[8,64], index: 1, kind: input, shape index: {}]   ;;  %s1101_s2 = inlined_call_operand.vmem [shape: f32[8,1], index: 2, kind: input, shape index: {}]   ;;  %s1102_s3 = inlined_call_operand.hbm [shape: f32[2,8,64], index: 3, kind: output, shape index: {}]  }
   0x1   :  { %10 = vsyncpa [#allocation3 + $0x1], 0  ;;  %s861_s12 = smov 0   ;;  %s863_s13 = smov 0  }
   0x2   :  { %s865_s14 = smov 0   ;;  %s867_s15 = smov 0  }
   0x3   :  { %s869_s16 = smov 0   ;;  %s871_s17 = smov 0  }
   0x4 LB: > { %s605_s18 = sadd.s32 4294967295, %s830_s17   ;;  %s606_s19 = sadd.s32 4294967294, %s830_s17   ;;  %s830_s17 = sphi %s871_s17, %s16_s17   ;;  %s826_s16 = sphi %s869_s16, %s1109_s16   ;;  %s822_s15 = sphi %s867_s15, %s1108_s15   ;;  %s818_s14 = sphi %s865_s14, %s1107_s14   ;;  %s814_s13 = sphi %s863_s13, %s1106_s13   ;;  %s810_s12 = sphi %s861_s12, %s1105_s12  }
   0x5   : > { %s28_s20 = sadd.s32 1, %s826_s16  ;;  %s107_s21 = sadd.s32 1, %s818_s14 }
   0x6   : > { %p30_p0 = scmp.ge.s32.totalorder %s28_s20, 2  ;;  %p117_p1 = scmp.ne.s32.totalorder %s818_s14, %s814_s13 }
   0x7   : > { %p118_p2 = scmp.eq.s32.totalorder %s605_s18, 1  ;;  %p123_p3 = scmp.ne.s32.totalorder %s814_s13, %s810_s12 }
   0x8   : > { %s1111_s20 = smov (%p30_p0, %s28_s20), 0  ;;  %p124_p5 = scmp.eq.s32.totalorder %s606_s19, 1 }
   0x9   : > { %p901_p4 = por %p118_p2, %p117_p1  ;;  %s102_s23 = ssub.s32 %s826_s16, %s1111_s20 }
   0xa   : > { %p609_p6 = scmp.ge.s32.totalorder %s830_s17, 1  ;;  %p105_p7 = scmp.eq.s32.totalorder %s102_s23, 0 }
   0xb   : > { %p908_p8 = por %p124_p5, %p123_p3  ;;  %p160_p9 = scmp.lt.s32.totalorder %s830_s17, 3 }
   0xc   : > { %s914_s25 = scalar_select %p105_p7, %s818_s14, %s107_s21  }
   0xd   : > { %p161_p10 = pnand %p609_p6, %p160_p9 }
   0xe   : > { %p188_p11 = scmp.lt.s32.totalorder (!%p161_p10), %s822_s15, 1  ;;  %s832_s4 = smov (!%p161_p10), 127  }
   0xf   : > { %164 = sbr.rel (%p161_p10) target bundleno = 444 (0x1bc), region = 32  ;;  %s834_s7 = smov (!%p161_p10), 8  }
  0x10   : > { %s835_s8 = smov (!%p161_p10), 16   ;;  %s836_s9 = smov (!%p161_p10), 40  }
  0x11   : > { %s837_s10 = smov (!%p161_p10), 32   ;;  %s838_s11 = smov (!%p161_p10), 24  }
  0x12   : > { %s839_s21 = smov (!%p161_p10), 56   ;;  %s840_s23 = smov (!%p161_p10), 48  }
  0x13   : > { %s637_s28 = sshll.u32 (!%p161_p10), %s822_s15, 3  ;;  %s772_s18 = scalar_lea.hbm (!%p161_p10), %s1102_s3, 16 }
  0x14   : > { %s189_s26 = scalar_select %p188_p11, %s822_s15, 1  ;;  %v197_v46 = vld [vmem:[%s1100_s1] sm:$0xff]  ;;  %vm240_vm0 = vcmask 523264   ;;  %v833_v55 = vmov 0   ;;  %vm488_vm1 = vcmask 64512   ;;  %vm490_vm2 = vcmask 130048  }
  0x15   : > { %750 = vset.pattern.permute.xlu1 %v833_v55  ;;  %751 = vset.pattern.permute.xlu0 %v833_v55  ;;  %v502_v62 = vld [vmem:[%s1101_s2] sm:$0xff]  ;;  %vm492_vm3 = vcmask 195584   ;;  %vm494_vm4 = vcmask 261120   ;;  %vm496_vm5 = vcmask 326656   ;;  %vm498_vm6 = vcmask 392192  }
  0x16   : > { %s640_s27 = smul.u32 144, %s189_s26  ;;  %s185_s26 = sand.u32 1, %s814_s13   ;;  %vm500_vm7 = vcmask 457728  }
  0x17   : > { %s512_s15 = scalar_lea.sflag [#allocation3], %s185_s26 }
  0x18   : > { %s921_s30 = scalar_lea.vmem %s1099_s0, %s640_s27  ;;  %s610_s27 = sshll.u32 %s185_s26, 3 }
  0x19   : > { %v924_v0 = vld [vmem:[%s921_s30 + $0x38] sm:$0xff]  ;;  %v927_v1 = vld [vmem:[%s921_s30 + $0x48] sm:$0xff]  ;;  %v940_v6 = vld [vmem:[%s921_s30 + $0x30] sm:$0xff]  ;;  %s187_s5 = scalar_lea.vmem [#allocation2], %s610_s27 }
  0x1a   : > { %v930_v2 = vld [vmem:[%s921_s30 + $0x18] sm:$0xff]  ;;  %v705_v3 = vpack.i.bf16 %v927_v1, %v924_v0  ;;  %v935_v4 = vld [vmem:[%s921_s30 + $0x28] sm:$0xff]  ;;  %v943_v7 = vld [vmem:[%s921_s30 + $0x40] sm:$0xff]  ;;  %s525_s6 = sshll.u32 %s187_s5, 4  ;;  %s526_s6 = int_to_ptr.vmem [resolvable:$true] %s525_s6 }
  0x1b   : > { %v715_v5 = vpack.i.bf16 %v935_v4, %v930_v2  ;;  %v946_v8 = vld [vmem:[%s921_s30 + $0x78] sm:$0xff]  ;;  %v949_v9 = vld [vmem:[%s921_s30 + $0x88] sm:$0xff]  ;;  %v952_v10 = vld [vmem:[%s921_s30 + $0x10] sm:$0xff]  ;;  %v710_v13 = vpack.i.bf16 %v943_v7, %v940_v6 }
  0x1c   : > { %706 = vrot.lane.b32.xlu0 %v705_v3, %s832_s4  ;;  %v955_v11 = vld [vmem:[%s921_s30 + $0x20] sm:$0xff]  ;;  %v725_v12 = vpack.i.bf16 %v949_v9, %v946_v8  ;;  %v964_v15 = vld [vmem:[%s921_s30 + $0x70] sm:$0xff]  ;;  %v199_v18 = vld [vmem:[%s921_s30 + $0x8] sm:$0xff] }
  0x1d   : > { %716 = vrot.lane.b32.xlu1 %v715_v5, %s832_s4  ;;  %v720_v14 = vpack.i.bf16 %v955_v11, %v952_v10  ;;  %v967_v16 = vld [vmem:[%s921_s30 + $0x80] sm:$0xff]  ;;  %v973_v19 = vld [vmem:[%s921_s30 + $0x58] sm:$0xff]  ;;  %v979_v21 = vld [vmem:[%s921_s30 + $0x68] sm:$0xff] }
  0x1e   : > { %726 = vrot.lane.b32.xlu2 %v725_v12, %s832_s4  ;;  %v730_v17 = vpack.i.bf16 %v967_v16, %v964_v15  ;;  %v976_v20 = vld [vmem:[%s921_s30] sm:$0xff]  ;;  %v735_v22 = vpack.i.bf16 %v973_v19, %v199_v18  ;;  %v985_v24 = vld [vmem:[%s921_s30 + $0x50] sm:$0xff] }
  0x1f   : > { %v740_v23 = vpack.i.bf16 %v976_v20, %v979_v21  ;;  %v988_v25 = vld [vmem:[%s921_s30 + $0x60] sm:$0xff] }
  0x20   : > { %v745_v26 = vpack.i.bf16 %v988_v25, %v985_v24 }
  0x24   : > { %711 = vrot.lane.b32.xlu0 %v710_v13, %s832_s4 }
  0x25   : > { %721 = vrot.lane.b32.xlu1 %v720_v14, %s832_s4 }
  0x26   : > { %731 = vrot.lane.b32.xlu2 %v730_v17, %s832_s4 }
  0x2c   : > { %736 = vrot.lane.b32.xlu0 %v735_v22, %s832_s4 }
  0x2d   : > { %741 = vrot.lane.b32.xlu1 %v740_v23, %s832_s4 }
  0x2e   : > { %746 = vrot.lane.b32.xlu2 %v745_v26, %s832_s4  ;;  %s523_s4 = scalar_lea.hbm %s1102_s3, %s637_s28 }
  0x78   : > { %v996_v31 = vpop.permute.xlu2 %726 }
  0x79   : > { %v728_v48 = vunpack.i.l.bf16 %v996_v31  ;;  %v729_v50 = vunpack.i.h.bf16 %v996_v31 }
  0x80   : > { %v1006_v40 = vpop.permute.xlu2 %731 }
  0x81   : > { %v733_v53 = vunpack.i.l.bf16 %v1006_v40  ;;  %v734_v54 = vunpack.i.h.bf16 %v1006_v40 }
  0x88   : > { %v747_v45 = vpop.permute.xlu2 %746 }
  0x89   : > { %v749_v49 = vunpack.i.h.bf16 %v747_v45  ;;  %v748_v52 = vunpack.i.l.bf16 %v747_v45 }
  0x8e   : > { %v992_v27 = vpop.permute.xlu0 %706 }
  0x8f   : > { %v717_v28 = vpop.permute.xlu1 %716  ;;  %v708_v29 = vunpack.i.l.bf16 %v992_v27  ;;  %v709_v30 = vunpack.i.h.bf16 %v992_v27 }
  0x90   : > { %v718_v32 = vunpack.i.l.bf16 %v717_v28  ;;  %v719_v33 = vunpack.i.h.bf16 %v717_v28 }
  0x91   : > { %308 = vmatpush.msra.mxu2 %v708_v29  ;;  %336 = vmatpush.msra.mxu3 %v709_v30 }
  0x92   : > { %252 = vmatpush.msra.mxu0 %v718_v32  ;;  %280 = vmatpush.msra.mxu1 %v719_v33 }
  0x96   : > { %v1000_v34 = vpop.permute.xlu0 %711 }
  0x97   : > { %v722_v35 = vpop.permute.xlu1 %721  ;;  %v713_v36 = vunpack.i.l.bf16 %v1000_v34  ;;  %v714_v37 = vunpack.i.h.bf16 %v1000_v34 }
  0x98   : > { %v724_v38 = vunpack.i.h.bf16 %v722_v35  ;;  %v723_v39 = vunpack.i.l.bf16 %v722_v35 }
  0x99   : > { %309 = vmatpush.msra.mxu2 %v713_v36  ;;  %337 = vmatpush.msra.mxu3 %v714_v37 }
  0x9a   : > { %281 = vmatpush.msra.mxu1 %v724_v38  ;;  %253 = vmatpush.msra.mxu0 %v723_v39 }
  0x9b   : > { %310 = vmatpush.msra.mxu2 %v924_v0  ;;  %338 = vmatpush.msra.mxu3 %v927_v1 }
  0x9c   : > { %282 = vmatpush.msra.mxu1 %v935_v4  ;;  %254 = vmatpush.msra.mxu0 %v930_v2 }
  0x9d   : > { %311 = vmatpush.msra.mxu2 %v940_v6  ;;  %339 = vmatpush.msra.mxu3 %v943_v7 }
  0x9e   : > { %283 = vmatpush.msra.mxu1 %v955_v11  ;;  %v737_v41 = vpop.permute.xlu0 %736  ;;  %255 = vmatpush.msra.mxu0 %v952_v10 }
  0x9f   : > { %312 = vmatpush.msra.mxu2 %v719_v33  ;;  %340 = vmatpush.msra.mxu3 %v708_v29  ;;  %v742_v42 = vpop.permute.xlu1 %741  ;;  %v738_v43 = vunpack.i.l.bf16 %v737_v41  ;;  %v739_v51 = vunpack.i.h.bf16 %v737_v41 }
  0xa0   : > { %284 = vmatpush.msra.mxu1 %v718_v32  ;;  %v744_v44 = vunpack.i.h.bf16 %v742_v42  ;;  %v743_v47 = vunpack.i.l.bf16 %v742_v42 }
  0xa1   : > { %256 = vmatpush.msra.mxu0 %v738_v43  ;;  %313 = vmatpush.msra.mxu2 %v724_v38 }
  0xa2   : > { %285 = vmatpush.msra.mxu1 %v723_v39  ;;  %341 = vmatpush.msra.mxu3 %v713_v36 }
  0xa3   : > { %257 = vmatpush.msra.mxu0 %v744_v44  ;;  %314 = vmatpush.msra.mxu2 %v935_v4 }
  0xa4   : > { %286 = vmatpush.msra.mxu1 %v930_v2  ;;  %342 = vmatpush.msra.mxu3 %v924_v0 }
  0xa5   : > { %258 = vmatpush.msra.mxu0 %v199_v18  ;;  %315 = vmatpush.msra.mxu2 %v955_v11 }
  0xa6   : > { %287 = vmatpush.msra.mxu1 %v952_v10  ;;  %343 = vmatpush.msra.mxu3 %v940_v6 }
  0xa7   : > { %629 = vmatmul.msk.f32.vlgmr.msra.gmra.mxu1 %vm240_vm0, %v197_v46  ;;  %630 = vmatmul.msk.f32.vlgmr.msra.gmra.mxu2 %vm240_vm0, %v197_v46 }
  0xa8   : > { %392 = vmatpush.msrb.mxu1 %v743_v47  ;;  %420 = vmatpush.msrb.mxu2 %v728_v48 }
  0xa9   : > { %448 = vmatpush.msrb.mxu3 %v729_v50  ;;  %259 = vmatpush.msra.mxu0 %v976_v20 }
  0xaa   : > { %393 = vmatpush.msrb.mxu1 %v749_v49  ;;  %421 = vmatpush.msrb.mxu2 %v733_v53 }
  0xab   : > { %364 = vmatpush.msrb.mxu0 %v739_v51  ;;  %449 = vmatpush.msrb.mxu3 %v734_v54 }
  0xac   : > { %394 = vmatpush.msrb.mxu1 %v979_v21  ;;  %422 = vmatpush.msrb.mxu2 %v946_v8 }
  0xad   : > { %365 = vmatpush.msrb.mxu0 %v748_v52  ;;  %450 = vmatpush.msrb.mxu3 %v949_v9 }
  0xae   : > { %395 = vmatpush.msrb.mxu1 %v988_v25  ;;  %423 = vmatpush.msrb.mxu2 %v964_v15 }
  0xaf   : > { %366 = vmatpush.msrb.mxu0 %v973_v19  ;;  %451 = vmatpush.msrb.mxu3 %v967_v16 }
  0xb0   : > { %396 = vmatpush.msrb.mxu1 %v739_v51  ;;  %424 = vmatpush.msrb.mxu2 %v743_v47 }
  0xb1   : > { %367 = vmatpush.msrb.mxu0 %v985_v24  ;;  %452 = vmatpush.msrb.mxu3 %v728_v48 }
  0xb2   : > { %628 = vmatmul.msk.f32.vlgmr.msra.gmra.mxu0 %vm240_vm0, %v197_v46  ;;  %397 = vmatpush.msrb.mxu1 %v748_v52 }
  0xb3   : > { %368 = vmatpush.msrb.mxu0 %v709_v30  ;;  %425 = vmatpush.msrb.mxu2 %v749_v49 }
  0xb4   : > { %453 = vmatpush.msrb.mxu3 %v733_v53  ;;  %398 = vmatpush.msrb.mxu1 %v973_v19 }
  0xb5   : > { %631 = vmatmul.msk.f32.vlgmr.msra.gmra.mxu3 %vm240_vm0, %v197_v46  ;;  %369 = vmatpush.msrb.mxu0 %v714_v37 }
  0xb6   : > { %454 = vmatpush.msrb.mxu3 %v946_v8  ;;  %399 = vmatpush.msrb.mxu1 %v985_v24 }
  0xb7   : > { %370 = vmatpush.msrb.mxu0 %v927_v1  ;;  %633 = vmatmul.msk.f32.vlgmr.msrb.gmra.mxu1 %vm240_vm0, %v197_v46 }
  0xb8   : > { %455 = vmatpush.msrb.mxu3 %v964_v15  ;;  %426 = vmatpush.msrb.mxu2 %v979_v21 }
  0xb9   : > { %371 = vmatpush.msrb.mxu0 %v943_v7 }
  0xba   : > { %632 = vmatmul.msk.f32.vlgmr.msrb.gmra.mxu0 %vm240_vm0, %v197_v46  ;;  %427 = vmatpush.msrb.mxu2 %v988_v25 }
  0xbb   : > { %634 = vmatmul.msk.f32.vlgmr.msrb.gmra.mxu2 %vm240_vm0, %v197_v46 }
  0xbd   : > { %635 = vmatmul.msk.f32.vlgmr.msrb.gmra.mxu3 %vm240_vm0, %v197_v46 }
 0x124   : > { %v289_v56 = vpop.f32.mrf.mxu1 }
 0x125   : > { %461 = vrot.lane.b32.xlu0 %v289_v56, %s834_s7  ;;  %s527_s7 = sshll.u32 %s523_s4, 4  ;;  %s528_s7 = int_to_ptr.hbm [resolvable:$true] %s527_s7 }
 0x12a   : > { %v317_v57 = vpop.f32.mrf.mxu2 }
 0x12b   : > { %465 = vrot.lane.b32.xlu1 %v317_v57, %s835_s8  ;;  %s766_s8 = sshra.s32 %s528_s7, 4  ;;  %s767_s8 = int_to_ptr.hbm [resolvable:$true] %s766_s8 }
 0x12c   : > { %p773_p1 = scmp.lt.s32.totalorder %s767_s8, %s1102_s3 }
 0x12f   : > { %v261_v58 = vpop.f32.mrf.mxu0 }
 0x134   : > { %v401_v59 = vpop.f32.mrf.mxu1 }
 0x135   : > { %477 = vrot.lane.b32.xlu1 %v401_v59, %s836_s9  ;;  %s768_s9 = scalar_lea.hbm %s767_s8, 8 }
 0x136   : > { %p769_p12 = scmp.ne.s32.totalorder %s767_s8, %s768_s9  ;;  %p774_p2 = scmp.lt.s32.totalorder %s772_s18, %s768_s9 }
 0x137   : > { %v373_v60 = vpop.f32.mrf.mxu0 }
 0x138   : > { %v345_v61 = vpop.f32.mrf.mxu3  ;;  %473 = vrot.lane.b32.xlu0 %v373_v60, %s837_s10  ;;  %p770_p13 = pnand %p769_p12, %p901_p4  ;;  %p775_p3 = por %p774_p2, %p773_p1 }
 0x139   : > { %469 = vrot.lane.b32.xlu2 %v345_v61, %s838_s11 }
 0x13a   : > { %p771_p0 = pneg %p770_p13 }
 0x13c   : > { %p776_p5 = pnand %p775_p3, %p771_p0 }
 0x13d   : > { %505 = vperm.xlu1 %750, %v502_v62  }
 0x13e   : > { %v429_v63 = vpop.f32.mrf.mxu2 }
 0x140   : > { %v457_v0 = vpop.f32.mrf.mxu3 }
 0x141   : > { %485 = vrot.lane.b32.xlu0 %v457_v0, %s839_s21  ;;  %481 = vrot.lane.b32.xlu2 %v429_v63, %s840_s23 }
 0x193   : > { %v470_v3 = vpop.permute.xlu2 %469 }
 0x197   : > { %v462_v2 = vpop.permute.xlu0 %461 }
 0x198   : > { %v489_v4 = vsel %vm488_vm1, %v261_v58, %v462_v2 }
 0x19b   : > { %v482_v11 = vpop.permute.xlu2 %481 }
 0x19d   : > { %v466_v1 = vpop.permute.xlu1 %465 }
 0x19e   : > { %v491_v6 = vsel %vm490_vm2, %v489_v4, %v466_v1 }
 0x19f   : > { %v493_v8 = vsel %vm492_vm3, %v491_v6, %v470_v3 }
 0x1a7   : > { %v478_v5 = vpop.permute.xlu1 %477 }
 0x1aa   : > { %v474_v7 = vpop.permute.xlu0 %473 }
 0x1ab   : > { %v495_v9 = vsel %vm494_vm4, %v493_v8, %v474_v7 }
 0x1ac   : > { %v497_v10 = vsel %vm496_vm5, %v495_v9, %v478_v5 }
 0x1ad   : > { %v499_v13 = vsel %vm498_vm6, %v497_v10, %v482_v11 }
 0x1af   : > { %v506_v12 = vpop.permute.xlu1 %505 }
 0x1b3   : > { %v486_v14 = vpop.permute.xlu0 %485 }
 0x1b4   : > { %v501_v15 = vsel %vm500_vm7, %v499_v13, %v486_v14 }
 0x1b5   : > { %v508_v16 = vadd.f32 %v506_v12, %v501_v15 }
 0x1b7   : > { %v509_v17 = vmax.f32 %v508_v16, 0.0 }
 0x1b9   : > { %510 = vst.msk [vmem:[%s187_s5] sm:$0xff] %vm240_vm0, %v509_v17 }
 0x1ba   : > { %779 = shalt.err (!%p776_p5)
}
 0x1bb   : > { %641 = dma.vmem_to_hbm [thread:$0]  (%p901_p4), %s526_s6, 128, %s528_s7, %s512_s15  }
 0x1bc PF: > { %p647_p6 = scmp.ge.s32.totalorder %s830_s17, 2  ;;  %s539_s23 = sand.u32 1, %s810_s12  }
 0x1bd   : > { %s540_s26 = scalar_lea.sflag [#allocation3], %s539_s23 }
 0x1be   : > { %p644_p7 = pnand %p647_p6, %p908_p8 }
 0x1c0   : > { %p645_p9 = pneg %p644_p7 }
 0x1c2   : > { %805 = dma.done.wait (%p645_p9), %s540_s26, 128  }
 0x1c3   : > { %807 = vsyncadd (%p645_p9), %s540_s26, 4294967168  ;;  %s16_s17 = sadd.s32 1, %s830_s17   ;;  %s1105_s12 = smov %s814_s13 }
 0x1c4   : > { %p13_p10 = scmp.ge.s32.totalorder %s16_s17, 4   ;;  %s1106_s13 = smov %s818_s14 }
 0x1c5   : > { %s1107_s14 = smov %s914_s25  ;;  %s1108_s15 = smov %s826_s16 }
 0x1c6   : > { %s1109_s16 = smov %s1111_s20  ;;  %15 = sbr.rel (!%p13_p10) target bundleno = 4 (0x4), region = 75 }
 0x1cb   :  { %546 = vsyncpa [#allocation3], 1 }
 0x1cc   :  { %548 = vsyncpa [#allocation3 + $0x1], 1 }

</bundles_post_ra>
